<compile_context>
chip_gen: v6e
topology: v6e:2x2x1
jax: 0.10.0
libtpu: 0.0.40
codegen_flags: <defaults>
</compile_context>

<pallas_src>
import math

import jax
import jax.numpy as jnp
from jax.experimental import pallas as pl
from jax.experimental.pallas import tpu as pltpu


def _identity_kernel(x_ref, o_ref):
    # Pure whole-tile copy: one DMA in, one DMA out per block.
    o_ref[...] = x_ref[...]


_LANE = 128
_TARGET_TILE_BYTES = 2 * 1024 * 1024  # ~2 MiB blocks amortize grid-step overhead


def _sublane_multiple(dtype) -> int:
    itemsize = jnp.dtype(dtype).itemsize
    if itemsize >= 4:
        return 8
    if itemsize == 2:
        return 16
    return 32


def identity(x: jax.Array) -> jax.Array:
    """Identity forward: returns a bit-exact copy of x (same shape, dtype)."""
    orig_shape = x.shape
    orig_dtype = x.dtype
    total = math.prod(orig_shape) if orig_shape else 1

    if total == 0:
        return x  # nothing to copy

    itemsize = jnp.dtype(orig_dtype).itemsize
    sub = _sublane_multiple(orig_dtype)

    # --- Lane-dense 2D view -------------------------------------------------
    # Fold the flat total into (R, C) with C a multiple of 128 so every store
    # is a full-lane (unmasked) vst. Prefer a folding that also keeps R >= 8
    # (sublane-dense vregs).
    lane_width = None
    if total % _LANE == 0:
        for cand in (4096, 2048, 1024, 512, 256, 128):
            if total % cand == 0 and total // cand >= 8:
                lane_width = cand
                break
        if lane_width is None:
            for cand in (4096, 2048, 1024, 512, 256, 128):
                if total % cand == 0:
                    lane_width = cand
                    break

    if lane_width is not None:
        R, C = total // lane_width, lane_width
    else:
        # Fallback (total not a multiple of 128): single logical row, full
        # extent in both dims of each block (Pallas masks the partial tail).
        R, C = 1, total

    x2 = x.reshape(R, C)

    # --- Tile selection -------------------------------------------------------
    # Row-only tiling with the full C extent (contiguous HBM DMAs, 1D grid).
    row_bytes = C * itemsize
    tr = max(1, _TARGET_TILE_BYTES // max(row_bytes, 1))
    if tr >= R:
        tr = R                                   # full extent: no (8,128) rule
    else:
        tr = max(sub, (tr // sub) * sub)         # dtype-packed sublane multiple

    if C * itemsize <= 4 * _TARGET_TILE_BYTES:
        tc = C                                   # common case: keep full row
    else:
        tc = 512 * _LANE                         # only for a truly huge row

    grid_r = pl.cdiv(R, tr)
    grid_c = pl.cdiv(C, tc)

    tile_bytes = tr * tc * itemsize
    # in + out, double-buffered, plus headroom; tile is capped at ~2 MiB so
    # this stays well under v7x's 64 MiB physical VMEM.
    vmem_limit = int(min(64 * 1024 * 1024, max(16 * 1024 * 1024, 6 * tile_bytes)))

    if grid_c == 1:
        grid = (grid_r,)
        in_specs = [pl.BlockSpec((tr, tc), lambda i: (i, 0))]
        out_specs = pl.BlockSpec((tr, tc), lambda i: (i, 0))
        dim_sem = ("parallel",)
    else:
        grid = (grid_r, grid_c)
        in_specs = [pl.BlockSpec((tr, tc), lambda i, j: (i, j))]
        out_specs = pl.BlockSpec((tr, tc), lambda i, j: (i, j))
        dim_sem = ("parallel", "parallel")

    out2 = pl.pallas_call(
        _identity_kernel,
        out_shape=jax.ShapeDtypeStruct((R, C), orig_dtype),
        grid_spec=pltpu.PrefetchScalarGridSpec(
            num_scalar_prefetch=0,
            grid=grid,
            in_specs=in_specs,
            out_specs=out_specs,
        ),
        compiler_params=pltpu.CompilerParams(
            dimension_semantics=dim_sem,
            vmem_limit_bytes=vmem_limit,
        ),
        # If the caller can donate x, add input_output_aliases={0: 0} here to
        # drop the separate output allocation (and all HBM traffic) entirely.
    )(x2)

    return out2.reshape(orig_shape)


if __name__ == "__main__":
    key = jax.random.PRNGKey(0)
    # Small NCHW input consistent with a typical conv-net feature map.
    x = jax.random.normal(key, (2, 4, 16, 16), dtype=jnp.float32)

    y = identity(x)
    y = jax.block_until_ready(y)

    assert y.shape == x.shape, (y.shape, x.shape)
    assert y.dtype == x.dtype, (y.dtype, x.dtype)
    assert jnp.array_equal(y, x), "Identity kernel output mismatch"

    print("KERNEL_OK")
</pallas_src>

<mosaic_0001>
module attributes {stable_mosaic.version = 11 : i64} {
  func.func @_identity_kernel(%arg0: i32, %arg1: memref<8x256xf32, #tpu.memory_space<vmem>>, %arg2: memref<8x256xf32, #tpu.memory_space<vmem>>) attributes {dimension_semantics = [#tpu.dimension_semantics<parallel>], iteration_bounds = array<i64: 1>, scalar_prefetch = 0 : i64, scratch_operands = 0 : i64, tpu.core_type = #tpu.core_type<tc>, window_params = [{transform_indices = @transform_0, window_bounds = array<i64: 8, 256>}, {transform_indices = @transform_1, window_bounds = array<i64: 8, 256>}]} {
    %c0 = arith.constant 0 : index
    %c0_0 = arith.constant 0 : index
    %0 = vector.load %arg1[%c0, %c0_0] : memref<8x256xf32, #tpu.memory_space<vmem>>, vector<8x256xf32>
    %c0_1 = arith.constant 0 : index
    %c0_2 = arith.constant 0 : index
    %1 = vector.load %arg2[%c0_1, %c0_2] : memref<8x256xf32, #tpu.memory_space<vmem>>, vector<8x256xf32>
    tpu.vector_store %arg2[%c0_1, %c0_2], %0 {strides = array<i32>} : memref<8x256xf32, #tpu.memory_space<vmem>>, vector<8x256xf32>,
    return
  }
  func.func @transform_0(%arg0: i32) -> (i32, i32) {
    %c0_i32 = arith.constant 0 : i32
    %c0_i32_0 = arith.constant 0 : i32
    return %arg0, %c0_i32 : i32, i32
  }
  func.func @transform_1(%arg0: i32) -> (i32, i32) {
    %c0_i32 = arith.constant 0 : i32
    %c0_i32_0 = arith.constant 0 : i32
    return %arg0, %c0_i32 : i32, i32
  }
}

</mosaic_0001>

<bundles_post_ra>
// kernel: tpu_custom_call.1
= control target key start
LH: loop header
LB: loop body
LE: loop exit
PB: predicated region body
PF: predicated region fallthrough
CT: control target
= control target key end

     0   :  { %6 = vsyncpa [#allocation3], 0  ;;  %s104_s0 = inlined_call_operand.hbm [shape: f32[8,256], index: 0, kind: input, shape index: {}]   ;;  %s105_s1 = inlined_call_operand.hbm [shape: f32[8,256], index: 1, kind: output, shape index: {}]  }
   0x1   :  { %7 = vsyncpa [#allocation4], 0  ;;  %s86_s6 = smov [#allocation2]  }
   0x2   :  { %s14_s7 = sshll.u32 %s86_s6, 4  ;;  %s15_s7 = int_to_ptr.vmem [resolvable:$true] %s14_s7 }
   0x3   :  { %s50_s8 = scalar_lea.vmem %s15_s7, 256  ;;  %p55_p1 = scmp.lt.s32.totalorder %s15_s7, %s15_s7 }
   0x4   :  { %p51_p0 = scmp.ne.s32.totalorder %s15_s7, %s50_s8  ;;  %p56_p2 = scmp.lt.s32.totalorder %s50_s8, %s50_s8 }
   0x6   :  { %p57_p3 = por %p56_p2, %p55_p1 }
   0x8   :  { %p58_p4 = pnand %p57_p3, %p51_p0 }
   0xa   :  { %61 = shalt.err (!%p58_p4)
}
   0xb   :  { %17 = dma.hbm_to_vmem [thread:$0]  %s104_s0, 256, %s15_s7, [#allocation3]  }
   0xc   :  { %82 = dma.done.wait [#allocation3], 256  }
   0xd   :  { %83 = vsyncadd [#allocation3], 4294967040  ;;  %s87_s11 = smov [#allocation5]   ;;  %v21_v0 = vld [vmem:[#allocation2] sm:$0xff]  ;;  %v22_v1 = vld [vmem:[#allocation2 + $0x8] sm:$0xff] }
   0xe   :  { %s31_s12 = sshll.u32 %s87_s11, 4  ;;  %23 = vst [vmem:[#allocation5] sm:$0xff] %v21_v0  ;;  %24 = vst [vmem:[#allocation5 + $0x8] sm:$0xff] %v22_v1  ;;  %s32_s12 = int_to_ptr.vmem [resolvable:$true] %s31_s12 }
   0xf   :  { %s62_s13 = scalar_lea.vmem %s32_s12, 256  ;;  %p67_p6 = scmp.lt.s32.totalorder %s32_s12, %s32_s12 }
  0x10   :  { %p63_p5 = scmp.ne.s32.totalorder %s32_s12, %s62_s13  ;;  %p68_p7 = scmp.lt.s32.totalorder %s62_s13, %s62_s13 }
  0x12   :  { %p69_p8 = por %p68_p7, %p67_p6 }
  0x14   :  { %p70_p9 = pnand %p69_p8, %p63_p5 }
  0x16   :  { %73 = shalt.err (!%p70_p9)
}
  0x17   :  { %34 = dma.vmem_to_hbm [thread:$0]  %s32_s12, 256, %s105_s1, [#allocation4]  }
  0x18   :  { %84 = dma.done.wait [#allocation4], 256  }
  0x19   :  { %85 = vsyncadd [#allocation4], 4294967040 }
  0x1a   :  { %38 = vsyncpa [#allocation3], 1 }
  0x1b   :  { %39 = vsyncpa [#allocation4], 1 }

</bundles_post_ra>
